<compile_context>
chip_gen: v5e
topology: v5e:2x2
jax: 0.10.0
libtpu: 0.0.40
codegen_flags: <defaults>
</compile_context>

<pallas_src>
import jax
import jax.numpy as jnp
from jax.experimental import pallas as pl
from jax.experimental.pallas import tpu as pltpu


def _round_up(x, m):
    return (x + m - 1) // m * m


def _linear_kernel(x_ref, wt_ref, b_ref, o_ref):
    # x_ref: (TB, dim) native dtype; wt_ref: (dim, num_labels) bf16 (resident);
    # b_ref: (1, num_labels) f32 (resident); o_ref: (TB, num_labels) f32.
    x = x_ref[...].astype(jnp.bfloat16)          # cast hides under the MXU pass
    acc = jnp.dot(x, wt_ref[...], preferred_element_type=jnp.float32)
    o_ref[...] = acc + b_ref[...]


_MAX_TB = 1024


def _vmem_capacity_bytes():
    """Generation-aware VMEM capacity (v5e/v6e: 128 MiB, v7x: 64 MiB per TC)."""
    try:
        info = pltpu.get_tpu_info()
        cap = getattr(info, "vmem_capacity_bytes", None)
        if cap:
            return int(cap)
    except Exception:
        pass
    return 64 * 1024 * 1024  # conservative fallback = v7x per-TC size


def prepare_params(weight, bias):
    """One-time packing of the frozen probe params.

    Args:
      weight: (num_labels, dim) f32 (torch nn.Linear convention).
      bias:   (num_labels,) f32.
    Returns:
      wt:  (dim, num_labels) bf16  -- transposed, VMEM-resident operand.
      b2d: (1, num_labels) f32     -- bias row.
    """
    num_labels, dim = weight.shape
    wt = jnp.asarray(weight.T.astype(jnp.bfloat16))
    b2d = bias.astype(jnp.float32).reshape(1, num_labels)
    return wt, b2d


def _pick_tb(B, dim, num_labels, vmem_budget, max_tb):
    nl_lanes = _round_up(num_labels, 128)
    # Resident bf16 W^T (counted double-buffered, conservative) + f32 bias row.
    resident = 2 * dim * nl_lanes * 2 + 2 * nl_lanes * 4
    # Per batch-row: double-buffered native-dtype x tile + double-buffered f32 out tile.
    per_row = 2 * (dim * 4 + nl_lanes * 4)
    avail = vmem_budget - resident
    if avail < 8 * per_row:
        # TODO(synk): add a num_labels grid axis (tile W^T along N) for probes whose
        # resident weights exceed the VMEM budget, instead of failing here.
        raise ValueError(
            f"resident weights ({resident} B) do not leave room in the VMEM "
            f"budget ({vmem_budget} B) for batch tiles (dim={dim}, "
            f"num_labels={num_labels})")
    tb = min(avail // per_row, max_tb)
    # Guarantee >= 2 grid steps on big batches so both v7x TensorCores get work.
    if B >= 512:
        tb = min(tb, _round_up(pl.cdiv(B, 2), 256))
    if tb >= B:
        return B                       # single full-extent block: always layout-legal
    if tb >= 256:
        return (tb // 256) * 256       # fill the 256x256 MXU / bf16 sublane packing
    return max((tb // 8) * 8, 8)


def linear_classifier_forward(x, wt, b2d, *, max_tb=_MAX_TB):
    """y = flatten(x) @ W.T + b. Returns (B, num_labels) float32 logits."""
    B = x.shape[0]
    x2d = x.reshape(B, -1)                     # metadata-only flatten
    dim, num_labels = wt.shape
    assert x2d.shape[1] == dim, (x2d.shape, dim)

    cap = _vmem_capacity_bytes()
    vmem_budget = int(cap * 0.55)              # buffer budget for tile sizing
    vmem_limit = int(cap * 0.75)               # Mosaic scoped-VMEM limit

    tb = _pick_tb(B, dim, num_labels, vmem_budget, max_tb)
    grid = (pl.cdiv(B, tb),)                   # non-divisible grid: partial last block,
                                               # OOB rows dropped on store (rows independent)

    return pl.pallas_call(
        _linear_kernel,
        out_shape=jax.ShapeDtypeStruct((B, num_labels), jnp.float32),
        grid=grid,
        in_specs=[
            pl.BlockSpec((tb, dim), lambda i: (i, 0)),           # streamed x tile
            pl.BlockSpec((dim, num_labels), lambda i: (0, 0)),   # resident bf16 W^T
            pl.BlockSpec((1, num_labels), lambda i: (0, 0)),     # resident bias row
        ],
        out_specs=pl.BlockSpec((tb, num_labels), lambda i: (i, 0)),
        compiler_params=pltpu.CompilerParams(
            dimension_semantics=("parallel",),  # batch axis shardable across TCs
            vmem_limit_bytes=vmem_limit,
        ),
    )(x2d, wt, b2d)


if __name__ == "__main__":
    key = jax.random.PRNGKey(0)
    k_x, k_w, k_x2, k_w2 = jax.random.split(key, 4)

    # --- small shapes consistent with the module: frozen features (B, C, S) ---
    B, C, S = 2, 4, 8
    dim = C * S
    num_labels = 16

    x = jax.random.normal(k_x, (B, C, S), dtype=jnp.float32)
    # Deterministic params matching __init__: weight ~ Normal(0, 0.01), bias = 0.
    weight = 0.01 * jax.random.normal(k_w, (num_labels, dim), dtype=jnp.float32)
    bias = jnp.zeros((num_labels,), dtype=jnp.float32)

    wt, b2d = prepare_params(weight, bias)
    y = jax.block_until_ready(linear_classifier_forward(x, wt, b2d))
    assert y.shape == (B, num_labels)

    # Reference at the same operand precision (bf16 operands, f32 accumulation).
    x_bf = x.reshape(B, -1).astype(jnp.bfloat16).astype(jnp.float32)
    w_bf = weight.astype(jnp.bfloat16).astype(jnp.float32)
    ref = x_bf @ w_bf.T + bias
    assert jnp.allclose(y, ref, atol=1e-3, rtol=1e-2), float(jnp.max(jnp.abs(y - ref)))

    # Sanity vs the full-f32 torch-equivalent reference (bf16 operands => ~1e-2 rel).
    ref_f32 = x.reshape(B, -1) @ weight.T + bias
    assert jnp.allclose(y, ref_f32, atol=5e-3, rtol=5e-2)

    # --- exercise the multi-step, partial-last-block path (non-divisible grid,
    # non-128-multiple label width) with a forced small batch tile -------------
    B2, dim2, nl2 = 300, 256, 200
    x2 = jax.random.normal(k_x2, (B2, dim2), dtype=jnp.float32)
    w2 = 0.01 * jax.random.normal(k_w2, (nl2, dim2), dtype=jnp.float32)
    b2 = jnp.zeros((nl2,), dtype=jnp.float32)
    wt2, b2d2 = prepare_params(w2, b2)
    y2 = jax.block_until_ready(linear_classifier_forward(x2, wt2, b2d2, max_tb=128))
    assert y2.shape == (B2, nl2)
    ref2 = (x2.astype(jnp.bfloat16).astype(jnp.float32)
            @ w2.astype(jnp.bfloat16).astype(jnp.float32).T + b2)
    assert jnp.allclose(y2, ref2, atol=1e-3, rtol=1e-2), float(jnp.max(jnp.abs(y2 - ref2)))

    print("KERNEL_OK")
</pallas_src>

<mosaic_0001>
module attributes {stable_mosaic.version = 11 : i64} {
  func.func @_linear_kernel(%arg0: i32, %arg1: memref<2x32xf32, #tpu.memory_space<vmem>>, %arg2: memref<32x16xbf16, #tpu.memory_space<vmem>>, %arg3: memref<1x16xf32, #tpu.memory_space<vmem>>, %arg4: memref<2x16xf32, #tpu.memory_space<vmem>>) attributes {dimension_semantics = [#tpu.dimension_semantics<parallel>], iteration_bounds = array<i64: 1>, scalar_prefetch = 0 : i64, scratch_operands = 0 : i64, tpu.core_type = #tpu.core_type<tc>, window_params = [{transform_indices = @transform_0, window_bounds = array<i64: 2, 32>}, {pipeline_mode = #tpu.pipeline_mode<synchronous>, transform_indices = @transform_1, window_bounds = array<i64: 32, 16>}, {pipeline_mode = #tpu.pipeline_mode<synchronous>, transform_indices = @transform_2, window_bounds = array<i64: 1, 16>}, {transform_indices = @transform_3, window_bounds = array<i64: 2, 16>}]} {
    %c0 = arith.constant 0 : index
    %c0_0 = arith.constant 0 : index
    %0 = vector.load %arg1[%c0, %c0_0] : memref<2x32xf32, #tpu.memory_space<vmem>>, vector<2x32xf32>
    %1 = arith.truncf %0 : vector<2x32xf32> to vector<2x32xbf16>
    %c0_1 = arith.constant 0 : index
    %c0_2 = arith.constant 0 : index
    %2 = vector.load %arg2[%c0_1, %c0_2] : memref<32x16xbf16, #tpu.memory_space<vmem>>, vector<32x16xbf16>
    %cst = arith.constant dense<0.000000e+00> : vector<2x16xf32>
    %3 = tpu.matmul %1, %2, %cst {dimension_numbers = #tpu.dot_dimension_numbers<[1], [0], [0], [1], [0, 0, 1, 1], [], []>} : vector<2x32xbf16>, vector<32x16xbf16>, vector<2x16xf32> -> vector<2x16xf32>
    %c0_3 = arith.constant 0 : index
    %c0_4 = arith.constant 0 : index
    %4 = vector.load %arg3[%c0_3, %c0_4] : memref<1x16xf32, #tpu.memory_space<vmem>>, vector<1x16xf32>
    %5 = vector.broadcast %4 : vector<1x16xf32> to vector<2x16xf32>
    %6 = arith.addf %3, %5 : vector<2x16xf32>
    %c0_5 = arith.constant 0 : index
    %c0_6 = arith.constant 0 : index
    %7 = vector.load %arg4[%c0_5, %c0_6] : memref<2x16xf32, #tpu.memory_space<vmem>>, vector<2x16xf32>
    tpu.vector_store %arg4[%c0_5, %c0_6], %6 {strides = array<i32>} : memref<2x16xf32, #tpu.memory_space<vmem>>, vector<2x16xf32>,
    return
  }
  func.func @transform_0(%arg0: i32) -> (i32, i32) {
    %c0_i32 = arith.constant 0 : i32
    %c0_i32_0 = arith.constant 0 : i32
    return %arg0, %c0_i32 : i32, i32
  }
  func.func @transform_1(%arg0: i32) -> (i32, i32) {
    %c0_i32 = arith.constant 0 : i32
    %c0_i32_0 = arith.constant 0 : i32
    %c0_i32_1 = arith.constant 0 : i32
    return %c0_i32, %c0_i32_0 : i32, i32
  }
  func.func @transform_2(%arg0: i32) -> (i32, i32) {
    %c0_i32 = arith.constant 0 : i32
    %c0_i32_0 = arith.constant 0 : i32
    %c0_i32_1 = arith.constant 0 : i32
    return %c0_i32, %c0_i32_0 : i32, i32
  }
  func.func @transform_3(%arg0: i32) -> (i32, i32) {
    %c0_i32 = arith.constant 0 : i32
    %c0_i32_0 = arith.constant 0 : i32
    return %arg0, %c0_i32 : i32, i32
  }
}

</mosaic_0001>

<bundles_post_ra>
// kernel: tpu_custom_call.1
= control target key start
LH: loop header
LB: loop body
LE: loop exit
PB: predicated region body
PF: predicated region fallthrough
CT: control target
= control target key end

     0   :  { %s148_s0 = inlined_call_operand.vmem [shape: f32[2,32], index: 0, kind: input, shape index: {}]   ;;  %s149_s1 = inlined_call_operand.vmem [shape: bf16[32,16], index: 1, kind: input, shape index: {}]   ;;  %s150_s2 = inlined_call_operand.vmem [shape: f32[1,16], index: 2, kind: input, shape index: {}]   ;;  %s151_s3 = inlined_call_operand.hbm [shape: f32[2,16], index: 3, kind: output, shape index: {}]  }
   0x1   :  { %v83_v0 = vld [vmem:[%s149_s1 + $0x8] sm:$0xff] }
   0x2   :  { %8 = vsyncpa [#allocation3], 0  ;;  %48 = vmatpush.bf16.msra.mxu0 %v83_v0  ;;  %v82_v1 = vld [vmem:[%s149_s1] sm:$0xff]  ;;  %vm38_vm0 = vcmask 261120   ;;  %s112_s20 = smov [#allocation2]   ;;  %s64_s24 = sshll.u32 %s151_s3, 4  ;;  %s65_s24 = int_to_ptr.hbm [resolvable:$true] %s64_s24 }
   0x3   :  { %v16_v2 = vld [vmem:[%s148_s0] sm:$0x3]  ;;  %s62_s21 = sshll.u32 %s112_s20, 4  ;;  %vm55_vm1 = vcmask 123904   ;;  %s63_s21 = int_to_ptr.vmem [resolvable:$true] %s62_s21 }
   0x4   :  { %v17_v3 = vpack.c.bf16 %v16_v2, %v16_v2  ;;  %v85_v4 = vld [vmem:[%s150_s2] ss:$0 sm:$0xff] }
   0x6   :  { %49 = vmatpush.bf16.msra.mxu0 %v82_v1 }
   0x9   :  { %81 = vmatmul.msk.bf16.vlgmr.msra.gmra.mxu0 %vm38_vm0, %v17_v3 }
  0x86   :  { %v51_v5 = vpop.f32.mrf.mxu0 }
  0x87   :  { %v52_v6 = vadd.f32 %v85_v4, %v51_v5 }
  0x89   :  { %56 = vst.msk [vmem:[#allocation2] sm:$0x3] %vm55_vm1, %v52_v6 }
  0x8a   :  { %67 = dma.vmem_to_hbm [thread:$0]  %s63_s21, 32, %s65_s24, [#allocation3]  }
  0x8e   :  { %v53_v7 = vpop.f32.mrf.mxu0 }
  0x8f   :  { %110 = dma.done.wait [#allocation3], 32  }
  0x90   :  { %111 = vsyncadd [#allocation3], 4294967264 }
  0x91   :  { %72 = vsyncpa [#allocation3], 1 }

</bundles_post_ra>
